<compile_context>
chip_gen: v7x
topology: tpu7x:2x2x1
jax: 0.10.0
libtpu: 0.0.40
codegen_flags: <defaults>
</compile_context>

<pallas_src>
import functools

import jax
import jax.numpy as jnp
from jax.experimental import pallas as pl
from jax.experimental.pallas import tpu as pltpu

LANES = 128          # TPU vreg lane width.
_MAX_BLOCK_B = 512   # rows of x / out per grid step (256-1024 is the sweet spot).


def _round_up(n, m):
    return ((n + m - 1) // m) * m


def policy_net_kernel(x_ref, w1_ref, b1_ref, w2_ref, b2_ref, out_ref):
    # x_ref:  (block_B, S)   w1_ref: (S, Hp)   b1_ref: (1, Hp)
    # w2_ref: (Hp, A)        b2_ref: (1, A)    out_ref: (block_B, A)
    x = x_ref[...]

    # fc1 + ReLU (MXU matmul, f32 accumulate). Padded hidden lanes stay exactly 0.
    h = jnp.dot(x, w1_ref[...], preferred_element_type=jnp.float32) + b1_ref[...]
    h = jnp.maximum(h, 0.0)

    # fc2: padded (zero) hidden rows of w2 contribute nothing.
    logits = (jnp.dot(h.astype(w2_ref.dtype), w2_ref[...],
                      preferred_element_type=jnp.float32) + b2_ref[...])

    # Softmax over the action dim (dim=1 of the original 2-D input).
    m = jnp.max(logits, axis=-1, keepdims=True)
    e = jnp.exp(logits - m)
    denom = jnp.sum(e, axis=-1, keepdims=True)
    inv = pl.reciprocal(denom, approx=True)    # EUP slot (otherwise idle after exp)
    inv = inv * (2.0 - denom * inv)            # one Newton step -> full f32 precision
    out_ref[...] = (e * inv).astype(out_ref.dtype)


def prepare_params(w1, b1, w2, b2, *, compute_dtype=jnp.float32):
    """One-time layout prep (do NOT call per forward step).

    Inputs in PyTorch nn.Linear convention:
      w1: (hidden, state_dim)  b1: (hidden,)
      w2: (action_num, hidden) b2: (action_num,)
    Returns kernel-layout params with the hidden dim zero-padded to a multiple
    of 128 (semantics-preserving: ReLU keeps padded lanes at 0, zero fc2 rows
    add nothing):
      w1p: (state_dim, Hp)  b1p: (1, Hp)  w2p: (Hp, action_num)  b2p: (1, action_num)

    compute_dtype=jnp.bfloat16 is recommended for throughput-sized batches on
    v6e/v7x (MXU-native); accumulation stays f32 inside the kernel.
    """
    hidden, state_dim = w1.shape
    action_num = w2.shape[0]
    hp = _round_up(max(hidden, LANES), LANES)
    pad_h = hp - hidden

    w1p = jnp.pad(jnp.transpose(w1), ((0, 0), (0, pad_h))).astype(compute_dtype)   # (S, Hp)
    b1p = jnp.pad(b1.reshape(1, hidden), ((0, 0), (0, pad_h))).astype(jnp.float32)  # (1, Hp)
    w2p = jnp.pad(jnp.transpose(w2), ((0, pad_h), (0, 0))).astype(compute_dtype)    # (Hp, A)
    b2p = b2.reshape(1, action_num).astype(jnp.float32)                             # (1, A)
    return w1p, b1p, w2p, b2p


def _pick_block_b(batch):
    """Largest row block (<= _MAX_BLOCK_B) that tiles the batch; 0 => needs padding."""
    if batch <= _MAX_BLOCK_B:
        return batch
    for blk in (_MAX_BLOCK_B, 256, 128, 64, 32, 16, 8):
        if batch % blk == 0:
            return blk
    return 0


def _policy_net_call(x, w1p, b1p, w2p, b2p, *, block_b):
    batch, state_dim = x.shape
    hp = w1p.shape[1]
    action_num = w2p.shape[1]
    grid = (batch // block_b,)
    return pl.pallas_call(
        policy_net_kernel,
        out_shape=jax.ShapeDtypeStruct((batch, action_num), jnp.float32),
        grid_spec=pltpu.PrefetchScalarGridSpec(
            num_scalar_prefetch=0,
            grid=grid,
            in_specs=[
                pl.BlockSpec((block_b, state_dim), lambda i: (i, 0)),
                # Constant index maps: weights/biases stay resident in VMEM
                # across grid steps (no per-step re-DMA).
                pl.BlockSpec((state_dim, hp), lambda i: (0, 0)),
                pl.BlockSpec((1, hp), lambda i: (0, 0)),
                pl.BlockSpec((hp, action_num), lambda i: (0, 0)),
                pl.BlockSpec((1, action_num), lambda i: (0, 0)),
            ],
            out_specs=pl.BlockSpec((block_b, action_num), lambda i: (i, 0)),
        ),
        compiler_params=pltpu.CompilerParams(
            # Row blocks are independent -> shard across both TCs on v7x.
            dimension_semantics=("parallel",)),
    )(x, w1p, b1p, w2p, b2p)


@jax.jit
def policy_net_forward(x, w1p, b1p, w2p, b2p):
    """x: (B, state_dim); params from prepare_params(). Returns (B, action_num) probs."""
    batch = x.shape[0]
    x = x.astype(w1p.dtype)
    block_b = _pick_block_b(batch)
    if block_b:
        return _policy_net_call(x, w1p, b1p, w2p, b2p, block_b=block_b)
    # Odd large batch: pad rows (zeros -> harmless), slice off outside the kernel.
    bp = _round_up(batch, 256)
    xp = jnp.pad(x, ((0, bp - batch), (0, 0)))
    return _policy_net_call(xp, w1p, b1p, w2p, b2p, block_b=256)[:batch]
    # TODO(synk): if this forward sits inside a Python rollout loop, wrap the
    # loop in lax.scan under one jit (or fold the time axis into the batch) so
    # dispatch + weight DMA is paid once, not per step.


if __name__ == "__main__":
    # Small shapes consistent with the module's forward: x is (batch, state_dim).
    batch, state_dim, hidden_dim, action_num = 8, 16, 32, 4

    key = jax.random.PRNGKey(0)
    kx, kw1, kb1, kw2, kb2 = jax.random.split(key, 5)

    x = jax.random.normal(kx, (batch, state_dim), dtype=jnp.float32)

    # PyTorch __init__: weight ~ N(0, 0.1); bias keeps default U(-1/sqrt(fan_in), 1/sqrt(fan_in)).
    w1 = 0.1 * jax.random.normal(kw1, (hidden_dim, state_dim), dtype=jnp.float32)
    b1 = jax.random.uniform(
        kb1, (hidden_dim,), dtype=jnp.float32,
        minval=-1.0 / jnp.sqrt(state_dim), maxval=1.0 / jnp.sqrt(state_dim))
    w2 = 0.1 * jax.random.normal(kw2, (action_num, hidden_dim), dtype=jnp.float32)
    b2 = jax.random.uniform(
        kb2, (action_num,), dtype=jnp.float32,
        minval=-1.0 / jnp.sqrt(hidden_dim), maxval=1.0 / jnp.sqrt(hidden_dim))

    # One-time layout prep (transpose / hidden-dim pad), kept out of the per-call path.
    params = prepare_params(w1, b1, w2, b2)
    params = jax.block_until_ready(params)

    out = policy_net_forward(x, *params)
    out = jax.block_until_ready(out)

    # Reference check in plain JAX (same math as the PyTorch forward).
    h_ref = jnp.maximum(x @ w1.T + b1, 0.0)
    logits_ref = h_ref @ w2.T + b2
    ref = jax.nn.softmax(logits_ref, axis=1)
    assert out.shape == (batch, action_num), "wrong output shape"
    assert jnp.allclose(out, ref, atol=1e-5, rtol=1e-5), "mismatch vs reference"
    assert jnp.allclose(jnp.sum(out, axis=1), 1.0, atol=1e-5), "softmax rows must sum to 1"

    print("KERNEL_OK")
</pallas_src>

<mosaic_0001>
module attributes {stable_mosaic.version = 11 : i64} {
  func.func @policy_net_kernel(%arg0: i32, %arg1: memref<8x16xf32, #tpu.memory_space<vmem>>, %arg2: memref<16x128xf32, #tpu.memory_space<vmem>>, %arg3: memref<1x128xf32, #tpu.memory_space<vmem>>, %arg4: memref<128x4xf32, #tpu.memory_space<vmem>>, %arg5: memref<1x4xf32, #tpu.memory_space<vmem>>, %arg6: memref<8x4xf32, #tpu.memory_space<vmem>>) attributes {dimension_semantics = [#tpu.dimension_semantics<parallel>], iteration_bounds = array<i64: 1>, scalar_prefetch = 0 : i64, scratch_operands = 0 : i64, tpu.core_type = #tpu.core_type<tc>, window_params = [{transform_indices = @transform_0, window_bounds = array<i64: 8, 16>}, {pipeline_mode = #tpu.pipeline_mode<synchronous>, transform_indices = @transform_1, window_bounds = array<i64: 16, 128>}, {pipeline_mode = #tpu.pipeline_mode<synchronous>, transform_indices = @transform_2, window_bounds = array<i64: 1, 128>}, {pipeline_mode = #tpu.pipeline_mode<synchronous>, transform_indices = @transform_3, window_bounds = array<i64: 128, 4>}, {pipeline_mode = #tpu.pipeline_mode<synchronous>, transform_indices = @transform_4, window_bounds = array<i64: 1, 4>}, {transform_indices = @transform_5, window_bounds = array<i64: 8, 4>}]} {
    %c0 = arith.constant 0 : index
    %c0_0 = arith.constant 0 : index
    %0 = vector.load %arg1[%c0, %c0_0] : memref<8x16xf32, #tpu.memory_space<vmem>>, vector<8x16xf32>
    %c0_1 = arith.constant 0 : index
    %c0_2 = arith.constant 0 : index
    %1 = vector.load %arg2[%c0_1, %c0_2] : memref<16x128xf32, #tpu.memory_space<vmem>>, vector<16x128xf32>
    %cst = arith.constant dense<0.000000e+00> : vector<8x128xf32>
    %2 = tpu.matmul %0, %1, %cst {dimension_numbers = #tpu.dot_dimension_numbers<[1], [0], [0], [1], [0, 0, 1, 1], [], []>} : vector<8x16xf32>, vector<16x128xf32>, vector<8x128xf32> -> vector<8x128xf32>
    %c0_3 = arith.constant 0 : index
    %c0_4 = arith.constant 0 : index
    %3 = vector.load %arg3[%c0_3, %c0_4] : memref<1x128xf32, #tpu.memory_space<vmem>>, vector<1x128xf32>
    %4 = vector.broadcast %3 : vector<1x128xf32> to vector<8x128xf32>
    %5 = arith.addf %2, %4 : vector<8x128xf32>
    %cst_5 = arith.constant 0.000000e+00 : f32
    %6 = vector.broadcast %cst_5 : f32 to vector<8x128xf32>
    %7 = arith.maximumf %5, %6 : vector<8x128xf32>
    %c0_6 = arith.constant 0 : index
    %c0_7 = arith.constant 0 : index
    %8 = vector.load %arg4[%c0_6, %c0_7] : memref<128x4xf32, #tpu.memory_space<vmem>>, vector<128x4xf32>
    %cst_8 = arith.constant dense<0.000000e+00> : vector<8x4xf32>
    %9 = tpu.matmul %7, %8, %cst_8 {dimension_numbers = #tpu.dot_dimension_numbers<[1], [0], [0], [1], [0, 0, 1, 1], [], []>} : vector<8x128xf32>, vector<128x4xf32>, vector<8x4xf32> -> vector<8x4xf32>
    %c0_9 = arith.constant 0 : index
    %c0_10 = arith.constant 0 : index
    %10 = vector.load %arg5[%c0_9, %c0_10] : memref<1x4xf32, #tpu.memory_space<vmem>>, vector<1x4xf32>
    %11 = vector.broadcast %10 : vector<1x4xf32> to vector<8x4xf32>
    %12 = arith.addf %9, %11 : vector<8x4xf32>
    %cst_11 = arith.constant dense<0xFF800000> : vector<8xf32>
    %13 = vector.multi_reduction <maximumf>, %12, %cst_11 [1] : vector<8x4xf32> to vector<8xf32>
    %14 = vector.shape_cast %13 : vector<8xf32> to vector<8x1xf32>
    %15 = vector.broadcast %14 : vector<8x1xf32> to vector<8x4xf32>
    %16 = arith.subf %12, %15 : vector<8x4xf32>
    %17 = math.exp %16 : vector<8x4xf32>
    %cst_12 = arith.constant dense<0.000000e+00> : vector<8xf32>
    %18 = vector.multi_reduction <add>, %17, %cst_12 [1] : vector<8x4xf32> to vector<8xf32>
    %19 = vector.shape_cast %18 : vector<8xf32> to vector<8x1xf32>
    %20 = tpu.reciprocal %19 {approx = true} : vector<8x1xf32> -> vector<8x1xf32>
    %21 = arith.mulf %19, %20 : vector<8x1xf32>
    %cst_13 = arith.constant 2.000000e+00 : f32
    %22 = vector.broadcast %cst_13 : f32 to vector<8x1xf32>
    %23 = arith.subf %22, %21 : vector<8x1xf32>
    %24 = arith.mulf %20, %23 : vector<8x1xf32>
    %25 = vector.broadcast %24 : vector<8x1xf32> to vector<8x4xf32>
    %26 = arith.mulf %17, %25 : vector<8x4xf32>
    %c0_14 = arith.constant 0 : index
    %c0_15 = arith.constant 0 : index
    %27 = vector.load %arg6[%c0_14, %c0_15] : memref<8x4xf32, #tpu.memory_space<vmem>>, vector<8x4xf32>
    tpu.vector_store %arg6[%c0_14, %c0_15], %26 {strides = array<i32>} : memref<8x4xf32, #tpu.memory_space<vmem>>, vector<8x4xf32>,
    return
  }
  func.func @transform_0(%arg0: i32) -> (i32, i32) {
    %c0_i32 = arith.constant 0 : i32
    %c0_i32_0 = arith.constant 0 : i32
    return %arg0, %c0_i32 : i32, i32
  }
  func.func @transform_1(%arg0: i32) -> (i32, i32) {
    %c0_i32 = arith.constant 0 : i32
    %c0_i32_0 = arith.constant 0 : i32
    %c0_i32_1 = arith.constant 0 : i32
    return %c0_i32, %c0_i32_0 : i32, i32
  }
  func.func @transform_2(%arg0: i32) -> (i32, i32) {
    %c0_i32 = arith.constant 0 : i32
    %c0_i32_0 = arith.constant 0 : i32
    %c0_i32_1 = arith.constant 0 : i32
    return %c0_i32, %c0_i32_0 : i32, i32
  }
  func.func @transform_3(%arg0: i32) -> (i32, i32) {
    %c0_i32 = arith.constant 0 : i32
    %c0_i32_0 = arith.constant 0 : i32
    %c0_i32_1 = arith.constant 0 : i32
    return %c0_i32, %c0_i32_0 : i32, i32
  }
  func.func @transform_4(%arg0: i32) -> (i32, i32) {
    %c0_i32 = arith.constant 0 : i32
    %c0_i32_0 = arith.constant 0 : i32
    %c0_i32_1 = arith.constant 0 : i32
    return %c0_i32, %c0_i32_0 : i32, i32
  }
  func.func @transform_5(%arg0: i32) -> (i32, i32) {
    %c0_i32 = arith.constant 0 : i32
    %c0_i32_0 = arith.constant 0 : i32
    return %arg0, %c0_i32 : i32, i32
  }
}

</mosaic_0001>

<bundles_post_ra>
// kernel: policy_net_forward.1
= control target key start
LH: loop header
LB: loop body
LE: loop exit
PB: predicated region body
PF: predicated region fallthrough
CT: control target
= control target key end

     0   :  { %v317_v0 = vmov 0.0|0.0   ;;  %vm318_vm0 = vmmov 0   ;;  %v319_v3 = vmov 0.0   ;;  %vm30_vm1 = vcmask 130048   ;;  %s419_s1 = inlined_call_operand.vmem [shape: f32[16,128], index: 1, kind: input, shape index: {}]   ;;  %s420_s3 = inlined_call_operand.vmem [shape: f32[128,4], index: 3, kind: input, shape index: {}]   ;;  %s421_s0 = inlined_call_operand.vmem [shape: f32[8,16], index: 0, kind: input, shape index: {}]   ;;  %s422_s2 = inlined_call_operand.vmem [shape: f32[1,128], index: 2, kind: input, shape index: {}]   ;;  %s423_s4 = inlined_call_operand.vmem [shape: f32[1,4], index: 4, kind: input, shape index: {}]   ;;  %s424_s5 = inlined_call_operand.vmem [shape: f32[8,4], index: 5, kind: output, shape index: {}]  }
   0x1   :  { %283 = vmatprep.subr.bf16.mxu0 %v317_v0  ;;  %v21_v1 = vld [vmem:[%s419_s1] sm:$0xff]  ;;  %v22_v2 = vld [vmem:[%s419_s1 + $0x8] sm:$0xff]  ;;  %245 = vmatprep.mubr.msk.f32.mxu0 %vm318_vm0, %v319_v3  ;;  %v107_v7 = vld [vmem:[%s420_s3 + $0x10] sm:$0xff]  ;;  %vm198_vm2 = vcmask 31744  }
   0x2   :  { %v284_v4 = vpack.c.bf16 %v22_v2, %v21_v1  ;;  %286 = vmatprep.subr.bf16.mxu1 %v317_v0  ;;  %v105_v5 = vld [vmem:[%s420_s3] sm:$0xff]  ;;  %v106_v6 = vld [vmem:[%s420_s3 + $0x8] sm:$0xff]  ;;  %280 = vmatprep.mubr.msk.f32.mxu1 %vm318_vm0, %v319_v3  ;;  %v108_v9 = vld [vmem:[%s420_s3 + $0x18] sm:$0xff] }
   0x3   :  { %v287_v8 = vpack.c.bf16 %v106_v6, %v105_v5  ;;  %v20_v10 = vld [vmem:[%s421_s0] sm:$0xff]  ;;  %v290_v11 = vpack.c.bf16 %v108_v9, %v107_v7  ;;  %v110_v13 = vld [vmem:[%s420_s3 + $0x28] sm:$0xff]  ;;  %v111_v15 = vld [vmem:[%s420_s3 + $0x30] sm:$0xff] }
   0x4   :  { %285 = vmatpush3.bf16.msra.mxu0 %v284_v4  ;;  %v109_v12 = vld [vmem:[%s420_s3 + $0x20] sm:$0xff]  ;;  %v112_v16 = vld [vmem:[%s420_s3 + $0x38] sm:$0xff]  ;;  %v114_v19 = vld [vmem:[%s420_s3 + $0x48] sm:$0xff] }
   0x5   :  { %288 = vmatpush3.bf16.msra.mxu1 %v287_v8  ;;  %v293_v14 = vpack.c.bf16 %v110_v13, %v109_v12  ;;  %v296_v17 = vpack.c.bf16 %v112_v16, %v111_v15  ;;  %v113_v18 = vld [vmem:[%s420_s3 + $0x40] sm:$0xff]  ;;  %v115_v21 = vld [vmem:[%s420_s3 + $0x50] sm:$0xff]  ;;  %v116_v22 = vld [vmem:[%s420_s3 + $0x58] sm:$0xff] }
   0x6   :  { %289 = vmatprep.subr.bf16.mxu1 %v317_v0  ;;  %v299_v20 = vpack.c.bf16 %v114_v19, %v113_v18  ;;  %v302_v23 = vpack.c.bf16 %v116_v22, %v115_v21  ;;  %v117_v24 = vld [vmem:[%s420_s3 + $0x60] sm:$0xff]  ;;  %v118_v25 = vld [vmem:[%s420_s3 + $0x68] sm:$0xff]  ;;  %v119_v27 = vld [vmem:[%s420_s3 + $0x70] sm:$0xff] }
   0x7   :  { %246 = vmatmul.mubr.msk.f32.vlgmr.msra.gmra.mrb[0].mxu0 %vm30_vm1, %v20_v10  ;;  %v305_v26 = vpack.c.bf16 %v118_v25, %v117_v24  ;;  %v120_v28 = vld [vmem:[%s420_s3 + $0x78] sm:$0xff]  ;;  %v218_v30 = vld [vmem:[%s422_s2] ss:$0 sm:$0xff] }
   0x8   :  { %v308_v29 = vpack.c.bf16 %v120_v28, %v119_v27  ;;  %v220_v35 = vld [vmem:[%s423_s4] ss:$0 sm:$0xff] }
   0x9   :  { %291 = vmatpush3.bf16.msra.mxu1 %v290_v11 }
   0xa   :  { %292 = vmatprep.subr.bf16.mxu1 %v317_v0 }
   0xd   :  { %294 = vmatpush3.bf16.msra.mxu1 %v293_v14 }
   0xe   :  { %295 = vmatprep.subr.bf16.mxu1 %v317_v0 }
  0x11   :  { %297 = vmatpush3.bf16.msra.mxu1 %v296_v17 }
  0x12   :  { %298 = vmatprep.subr.bf16.mxu1 %v317_v0 }
  0x15   :  { %300 = vmatpush3.bf16.msra.mxu1 %v299_v20 }
  0x16   :  { %301 = vmatprep.subr.bf16.mxu1 %v317_v0 }
  0x19   :  { %303 = vmatpush3.bf16.msra.mxu1 %v302_v23 }
  0x1a   :  { %304 = vmatprep.subr.bf16.mxu1 %v317_v0 }
  0x1d   :  { %306 = vmatpush3.bf16.msra.mxu1 %v305_v26 }
  0x1e   :  { %307 = vmatprep.subr.bf16.mxu1 %v317_v0 }
  0x21   :  { %309 = vmatpush3.bf16.msra.mxu1 %v308_v29 }
  0xda   :  { %v100_v31 = vpop.f32.mrb[0].mxu0 }
  0xdb   :  { %v101_v32 = vadd.f32 %v218_v30, %v100_v31  ;;  %v247_v33 = vpop.f32.mrb[1].mxu0 }
  0xdd   :  { %v104_v34 = vmax.f32 %v101_v32, 0.0 }
  0xdf   :  { %281 = vmatmul.mubr.f32.vlgmr.msra.gmra.mrb[0].mxu1 %v104_v34 }
 0x1b2   :  { %v194_v36 = vpop.f32.mrb[0].mxu1 }
 0x1b3   :  { %v195_v37 = vadd.f32 %v220_v35, %v194_v36  ;;  %v282_v38 = vpop.f32.mrb[1].mxu1 }
 0x1b5   :  { %v199_v39 = vsel %vm198_vm2, %v195_v37, -inf }
 0x1b6   :  { %200 = vmax.xlane.f32.xlu0 %v199_v39 }
 0x243   :  { %v201_v40 = vpop.xlane.xlu0 %200 }
 0x244   :  { %v202_v41 = vsub.f32 %v195_v37, %v201_v40 }
 0x246   :  { %v203_v42 = vmul.f32 1.442695, %v202_v41 }
 0x248   :  { %313 = vpow2.f32 %v203_v42 }
 0x252   :  { %v314_v43 = vpop.eup %313 }
 0x253   :  { %v205_v44 = vsel %vm198_vm2, %v314_v43, 0.0 }
 0x254   :  { %206 = vadd.xlane.f32.xlu0 %v205_v44 }
 0x2e1   :  { %v207_v45 = vpop.xlane.xlu0 %206 }
 0x2e2   :  { %315 = vrcp.f32 %v207_v45 }
 0x2ec   :  { %v316_v46 = vpop.eup %315 }
 0x2ed   :  { %v209_v47 = vmul.f32 %v316_v46, %v207_v45 }
 0x2ef   :  { %v210_v48 = vsub.f32 2.0, %v209_v47 }
 0x2f1   :  { %v211_v49 = vmul.f32 %v316_v46, %v210_v48 }
 0x2f3   :  { %v212_v50 = vmul.f32 %v314_v43, %v211_v49 }
 0x2f5   :  { %213 = vst.msk [vmem:[%s424_s5] sm:$0xff] %vm198_vm2, %v212_v50 }

</bundles_post_ra>
